<compile_context>
chip_gen: v6e
topology: v6e:2x2x1
jax: 0.10.0
libtpu: 0.0.40
codegen_flags: <defaults>
</compile_context>

<pallas_src>
import functools

import jax
import jax.numpy as jnp
from jax.experimental import pallas as pl
from jax.experimental.pallas import tpu as pltpu

_VMEM_LIMIT = 48 * 1024 * 1024  # safe on v7x (64 MiB physical) and v5e/v6e


def _round_up(v, m):
    return (v + m - 1) // m * m


def _pick_tiles(n, tile_m, tile_k):
    """Clamp (tm, tk) to the graph size; return (padded_N, tm, tk).

    tile_m / tile_k must be power-of-two multiples of 128. Padded N is a
    multiple of max(tm, tk), so both tiles divide it exactly.
    """
    for t in (tile_m, tile_k):
        assert t >= 128 and t % 128 == 0 and (t & (t - 1)) == 0, t
    np128 = _round_up(n, 128)
    cap = pl.next_power_of_2(np128)
    tm = min(tile_m, cap)
    tk = min(tile_k, cap)
    np_ = _round_up(np128, max(tm, tk))
    # keep >= 2 row blocks so the 'parallel' axis shards across v7x's 2 TCs
    if np_ // tm < 2 and tm > 128:
        tm //= 2
    return np_, tm, tk


# --------------------------------------------------------------------------
# GIN layer kernel: h_out = relu( W_b relu( W_a ((A + I) @ h_in) + b_a ) + b_b )
# grid = (row blocks i [parallel], K blocks k [arbitrary/reduction])
# --------------------------------------------------------------------------
def _gin_layer_kernel(a_ref, h_ref, wa_ref, ba_ref, wb_ref, bb_ref,
                      out_ref, acc_ref):
    k = pl.program_id(1)

    @pl.when(k == 0)
    def _():
        acc_ref[...] = jnp.zeros_like(acc_ref)

    # A is stored int8 in HBM (halves the dominant HBM stream); cast the tile
    # to bf16 on the VPU right before the MXU dot. f32 accumulation in VMEM.
    a_tile = a_ref[...].astype(jnp.bfloat16)
    acc_ref[...] += jnp.dot(a_tile, h_ref[...],
                            preferred_element_type=jnp.float32)

    @pl.when(k == pl.num_programs(1) - 1)
    def _():
        z = jnp.dot(acc_ref[...].astype(jnp.bfloat16), wa_ref[...],
                    preferred_element_type=jnp.float32) + ba_ref[...]
        z = jnp.maximum(z, 0.0)                       # ReLU inside the GIN MLP
        z = jnp.dot(z.astype(jnp.bfloat16), wb_ref[...],
                    preferred_element_type=jnp.float32) + bb_ref[...]
        z = jnp.maximum(z, 0.0)                       # F.relu after the conv
        out_ref[...] = z.astype(out_ref.dtype)


def _gin_layer(adj, h_in, wa, ba, wb, bb, *, tile_m, tile_k):
    np_, fin = h_in.shape
    hmid = wa.shape[1]
    hout = wb.shape[1]
    n_row = np_ // tile_m
    n_k = np_ // tile_k

    flops = 2 * np_ * np_ * fin + 2 * np_ * fin * hmid + 2 * np_ * hmid * hout
    bytes_accessed = (np_ * np_ * 1                      # int8 A, streamed once
                      + n_row * np_ * fin * 2            # h_in re-streamed per row block
                      + np_ * hout * 2                   # output
                      + (fin * hmid + hmid * hout) * 2   # resident bf16 weights
                      + (hmid + hout) * 4)               # f32 biases

    return pl.pallas_call(
        _gin_layer_kernel,
        out_shape=jax.ShapeDtypeStruct((np_, hout), jnp.bfloat16),
        grid_spec=pltpu.PrefetchScalarGridSpec(
            num_scalar_prefetch=0,
            grid=(n_row, n_k),
            in_specs=[
                # If a profile shows exposed DMA at K-step boundaries, add
                # pipeline_mode=pl.Buffered(3) on the A / h_in specs.
                pl.BlockSpec((tile_m, tile_k), lambda i, k: (i, k)),  # A tile (int8)
                pl.BlockSpec((tile_k, fin),    lambda i, k: (k, 0)),  # h_in tile
                pl.BlockSpec((fin, hmid),      lambda i, k: (0, 0)),  # W_a (resident)
                pl.BlockSpec((1, hmid),        lambda i, k: (0, 0)),  # b_a
                pl.BlockSpec((hmid, hout),     lambda i, k: (0, 0)),  # W_b (resident)
                pl.BlockSpec((1, hout),        lambda i, k: (0, 0)),  # b_b
            ],
            out_specs=pl.BlockSpec((tile_m, hout), lambda i, k: (i, 0)),
            scratch_shapes=[pltpu.VMEM((tile_m, fin), jnp.float32)],
        ),
        compiler_params=pltpu.CompilerParams(
            dimension_semantics=("parallel", "arbitrary"),
            vmem_limit_bytes=_VMEM_LIMIT,
        ),
        cost_estimate=pl.CostEstimate(flops=flops, transcendentals=0,
                                      bytes_accessed=bytes_accessed),
    )(adj, h_in, wa, ba, wb, bb)


# --------------------------------------------------------------------------
# Pool + FC kernel: out = W_f2 relu( W_f1 ((onehot @ h2) / counts) + b_f1 ) + b_f2
# grid = (K blocks over nodes [arbitrary/reduction],)
# --------------------------------------------------------------------------
def _pool_fc_kernel(p_ref, h_ref, invc_ref, wf1_ref, bf1_ref, wf2_ref, bf2_ref,
                    out_ref, acc_ref):
    k = pl.program_id(0)

    @pl.when(k == 0)
    def _():
        acc_ref[...] = jnp.zeros_like(acc_ref)

    p_tile = p_ref[...].astype(jnp.bfloat16)       # int8 one-hot -> bf16 (exact)
    acc_ref[...] += jnp.dot(p_tile, h_ref[...],
                            preferred_element_type=jnp.float32)

    @pl.when(k == pl.num_programs(0) - 1)
    def _():
        pooled = acc_ref[...] * invc_ref[...]          # exact mean in f32
        z = jnp.dot(pooled.astype(jnp.bfloat16), wf1_ref[...],
                    preferred_element_type=jnp.float32) + bf1_ref[...]
        z = jnp.maximum(z, 0.0)
        out = jnp.dot(z.astype(jnp.bfloat16), wf2_ref[...],
                      preferred_element_type=jnp.float32) + bf2_ref[...]
        out_ref[...] = out.astype(out_ref.dtype)


def _pool_fc(pool, h2, inv_counts, wf1, bf1, wf2, bf2, *, tile_k):
    gp, np_ = pool.shape
    hp = h2.shape[1]
    cp = wf2.shape[1]
    n_k = np_ // tile_k

    flops = 2 * gp * np_ * hp + 2 * gp * hp * hp + 2 * gp * hp * cp
    bytes_accessed = (gp * np_ * 1 + np_ * hp * 2 + (hp * hp + hp * cp) * 2
                      + (gp * cp + hp + cp + gp) * 4)

    return pl.pallas_call(
        _pool_fc_kernel,
        out_shape=jax.ShapeDtypeStruct((gp, cp), jnp.float32),
        grid_spec=pltpu.PrefetchScalarGridSpec(
            num_scalar_prefetch=0,
            grid=(n_k,),
            in_specs=[
                pl.BlockSpec((gp, tile_k), lambda k: (0, k)),  # int8 one-hot tile
                pl.BlockSpec((tile_k, hp), lambda k: (k, 0)),  # h2 tile
                pl.BlockSpec((gp, 1),      lambda k: (0, 0)),  # 1 / |graph g|
                pl.BlockSpec((hp, hp),     lambda k: (0, 0)),  # W_f1
                pl.BlockSpec((1, hp),      lambda k: (0, 0)),  # b_f1
                pl.BlockSpec((hp, cp),     lambda k: (0, 0)),  # W_f2
                pl.BlockSpec((1, cp),      lambda k: (0, 0)),  # b_f2
            ],
            out_specs=pl.BlockSpec((gp, cp), lambda k: (0, 0)),
            scratch_shapes=[pltpu.VMEM((gp, hp), jnp.float32)],
        ),
        compiler_params=pltpu.CompilerParams(
            dimension_semantics=("arbitrary",),
            vmem_limit_bytes=_VMEM_LIMIT,
        ),
        cost_estimate=pl.CostEstimate(flops=flops, transcendentals=0,
                                      bytes_accessed=bytes_accessed),
    )(pool, h2, inv_counts, wf1, bf1, wf2, bf2)


# --------------------------------------------------------------------------
# Forward wrapper
# --------------------------------------------------------------------------
@functools.partial(jax.jit, static_argnames=("num_graphs", "tile_m", "tile_k"))
def gin_mlp_forward(x, edge_index, batch, params, *, num_graphs,
                    tile_m=1024, tile_k=1024):
    """Forward pass of GINMLPModel.

    x:          (N, input_dim) f32 node features
    edge_index: (2, E) int32 edges; messages flow edge_index[0] -> edge_index[1]
    batch:      (N,) int32 graph assignment per node
    """
    n, f = x.shape
    h = params["w1a"].shape[1]
    c = params["wf2"].shape[1]

    np_, tm, tk = _pick_tiles(n, tile_m, tile_k)
    fp = _round_up(f, 128)          # lane-dense input dim (keep minimal 128 pad)
    hp = _round_up(h, 128)          # lane-dense hidden dim
    cp = _round_up(c, 128)          # lane-dense class dim (unmasked stores)
    gp = _round_up(num_graphs, 32)  # 32 sublanes: int8 pool tile min-tile

    bf16 = jnp.bfloat16

    # --- graph glue (plain JAX): adjacency built directly in int8 ----------
    # A[dst, src] = edge multiplicity; GIN identity (1+eps)*x, eps=0, folded
    # in. int8 is exact for multiplicities <= 127 (edges appear once here).
    src, dst = edge_index[0], edge_index[1]
    ids = jnp.arange(n)
    adj = jnp.zeros((np_, np_), jnp.int8)
    adj = adj.at[dst, src].add(jnp.ones(src.shape, jnp.int8))
    adj = adj.at[ids, ids].add(jnp.ones((n,), jnp.int8))

    xp = jnp.zeros((np_, fp), bf16).at[:n, :f].set(x.astype(bf16))

    one_hot = (batch[None, :] == jnp.arange(gp)[:, None])          # (gp, n) bool
    counts = jnp.maximum(
        one_hot.sum(axis=1, keepdims=True).astype(jnp.float32), 1.0)
    pool = jnp.zeros((gp, np_), jnp.int8).at[:, :n].set(one_hot.astype(jnp.int8))
    inv_counts = (1.0 / counts).astype(jnp.float32)                # (gp, 1)

    def pad_w(w, rows, cols):
        return jnp.zeros((rows, cols), bf16).at[:w.shape[0], :w.shape[1]].set(
            w.astype(bf16))

    def pad_b(b, cols):
        return jnp.zeros((1, cols), jnp.float32).at[:, :b.shape[1]].set(
            b.astype(jnp.float32))

    w1a = pad_w(params["w1a"], fp, hp); b1a = pad_b(params["b1a"], hp)
    w1b = pad_w(params["w1b"], hp, hp); b1b = pad_b(params["b1b"], hp)
    w2a = pad_w(params["w2a"], hp, hp); b2a = pad_b(params["b2a"], hp)
    w2b = pad_w(params["w2b"], hp, hp); b2b = pad_b(params["b2b"], hp)
    wf1 = pad_w(params["wf1"], hp, hp); bf1 = pad_b(params["bf1"], hp)
    wf2 = pad_w(params["wf2"], hp, cp); bf2 = pad_b(params["bf2"], cp)

    h1 = _gin_layer(adj, xp, w1a, b1a, w1b, b1b, tile_m=tm, tile_k=tk)  # conv1 + relu
    h2 = _gin_layer(adj, h1, w2a, b2a, w2b, b2b, tile_m=tm, tile_k=tk)  # conv2 + relu
    out_padded = _pool_fc(pool, h2, inv_counts, wf1, bf1, wf2, bf2,
                          tile_k=tk)                                    # pool + fc1/fc2

    return out_padded[:num_graphs, :c]


def init_params(key, input_dim, hidden_dim, num_classes):
    """Deterministic parameter init. Linear weights stored as (in, out)."""
    ks = jax.random.split(key, 8)

    def lin(k, fan_in, fan_out):
        bound = 1.0 / jnp.sqrt(fan_in)
        kw, kb = jax.random.split(k)
        w = jax.random.uniform(kw, (fan_in, fan_out), jnp.float32, -bound, bound)
        b = jax.random.uniform(kb, (1, fan_out), jnp.float32, -bound, bound)
        return w, b

    p = {}
    p["w1a"], p["b1a"] = lin(ks[0], input_dim, hidden_dim)
    p["w1b"], p["b1b"] = lin(ks[1], hidden_dim, hidden_dim)
    p["w2a"], p["b2a"] = lin(ks[2], hidden_dim, hidden_dim)
    p["w2b"], p["b2b"] = lin(ks[3], hidden_dim, hidden_dim)
    p["wf1"], p["bf1"] = lin(ks[4], hidden_dim, hidden_dim)
    p["wf2"], p["bf2"] = lin(ks[5], hidden_dim, num_classes)
    return p


if __name__ == "__main__":
    key = jax.random.PRNGKey(0)

    # small graph batch: 2 graphs x 4 nodes = 8 nodes
    num_nodes, input_dim, hidden_dim, num_classes, num_graphs = 8, 16, 32, 4, 2

    kx, kp = jax.random.split(key)
    x = jax.random.normal(kx, (num_nodes, input_dim), jnp.float32)

    # undirected ring within each graph of 4 nodes
    edges = []
    for g in range(num_graphs):
        base = g * 4
        for i in range(4):
            a, b = base + i, base + (i + 1) % 4
            edges.append((a, b))
            edges.append((b, a))
    edge_index = jnp.array(edges, jnp.int32).T               # (2, E)
    batch = jnp.array([0] * 4 + [1] * 4, jnp.int32)          # (N,)

    params = init_params(kp, input_dim, hidden_dim, num_classes)

    # default tm/tk=1024 are clamped to the tiny demo graph automatically;
    # for production graphs sweep tile_m/tile_k in 512..2048.
    out = gin_mlp_forward(x, edge_index, batch, params, num_graphs=num_graphs)
    out = jax.block_until_ready(out)
    assert out.shape == (num_graphs, num_classes)
    assert bool(jnp.all(jnp.isfinite(out)))
    print("KERNEL_OK")
</pallas_src>

<mosaic_0001>
module attributes {stable_mosaic.version = 11 : i64} {
  func.func @_gin_layer_kernel(%arg0: i32, %arg1: i32, %arg2: memref<128x128xi8, #tpu.memory_space<vmem>>, %arg3: memref<128x128xbf16, #tpu.memory_space<vmem>>, %arg4: memref<128x128xbf16, #tpu.memory_space<vmem>>, %arg5: memref<1x128xf32, #tpu.memory_space<vmem>>, %arg6: memref<128x128xbf16, #tpu.memory_space<vmem>>, %arg7: memref<1x128xf32, #tpu.memory_space<vmem>>, %arg8: memref<128x128xbf16, #tpu.memory_space<vmem>>, %arg9: memref<128x128xf32, #tpu.memory_space<vmem>>) attributes {dimension_semantics = [#tpu.dimension_semantics<parallel>, #tpu.dimension_semantics<arbitrary>], iteration_bounds = array<i64: 1, 1>, scalar_prefetch = 0 : i64, scratch_operands = 1 : i64, tpu.core_type = #tpu.core_type<tc>, window_params = [{transform_indices = @transform_0, window_bounds = array<i64: 128, 128>}, {transform_indices = @transform_1, window_bounds = array<i64: 128, 128>}, {pipeline_mode = #tpu.pipeline_mode<synchronous>, transform_indices = @transform_2, window_bounds = array<i64: 128, 128>}, {pipeline_mode = #tpu.pipeline_mode<synchronous>, transform_indices = @transform_3, window_bounds = array<i64: 1, 128>}, {pipeline_mode = #tpu.pipeline_mode<synchronous>, transform_indices = @transform_4, window_bounds = array<i64: 128, 128>}, {pipeline_mode = #tpu.pipeline_mode<synchronous>, transform_indices = @transform_5, window_bounds = array<i64: 1, 128>}, {transform_indices = @transform_6, window_bounds = array<i64: 128, 128>}]} {
    %c0_i32 = arith.constant 0 : i32
    %0 = arith.cmpi eq, %arg1, %c0_i32 : i32
    %1 = arith.extui %0 : i1 to i32
    %c0_i32_0 = arith.constant 0 : i32
    %2 = arith.cmpi ne, %1, %c0_i32_0 : i32
    scf.if %2 {
      %cst_10 = arith.constant 0.000000e+00 : f32
      %13 = vector.broadcast %cst_10 : f32 to vector<128x128xf32>
      %c0_11 = arith.constant 0 : index
      %c0_12 = arith.constant 0 : index
      %14 = vector.load %arg9[%c0_11, %c0_12] : memref<128x128xf32, #tpu.memory_space<vmem>>, vector<128x128xf32>
      tpu.vector_store %arg9[%c0_11, %c0_12], %13 {strides = array<i32>} : memref<128x128xf32, #tpu.memory_space<vmem>>, vector<128x128xf32>,
    } else {
    }
    %c0 = arith.constant 0 : index
    %c0_1 = arith.constant 0 : index
    %3 = vector.load %arg2[%c0, %c0_1] : memref<128x128xi8, #tpu.memory_space<vmem>>, vector<128x128xi8>
    %4 = arith.sitofp %3 : vector<128x128xi8> to vector<128x128xbf16>
    %c0_2 = arith.constant 0 : index
    %c0_3 = arith.constant 0 : index
    %5 = vector.load %arg9[%c0_2, %c0_3] : memref<128x128xf32, #tpu.memory_space<vmem>>, vector<128x128xf32>
    %c0_4 = arith.constant 0 : index
    %c0_5 = arith.constant 0 : index
    %6 = vector.load %arg3[%c0_4, %c0_5] : memref<128x128xbf16, #tpu.memory_space<vmem>>, vector<128x128xbf16>
    %cst = arith.constant dense<0.000000e+00> : vector<128x128xf32>
    %7 = tpu.matmul %4, %6, %cst {dimension_numbers = #tpu.dot_dimension_numbers<[1], [0], [0], [1], [0, 0, 1, 1], [], []>} : vector<128x128xbf16>, vector<128x128xbf16>, vector<128x128xf32> -> vector<128x128xf32>
    %8 = arith.addf %5, %7 : vector<128x128xf32>
    %c0_6 = arith.constant 0 : index
    %c0_7 = arith.constant 0 : index
    %9 = vector.load %arg9[%c0_6, %c0_7] : memref<128x128xf32, #tpu.memory_space<vmem>>, vector<128x128xf32>
    tpu.vector_store %arg9[%c0_6, %c0_7], %8 {strides = array<i32>} : memref<128x128xf32, #tpu.memory_space<vmem>>, vector<128x128xf32>,
    %c0_i32_8 = arith.constant 0 : i32
    %10 = arith.cmpi eq, %arg1, %c0_i32_8 : i32
    %11 = arith.extui %10 : i1 to i32
    %c0_i32_9 = arith.constant 0 : i32
    %12 = arith.cmpi ne, %11, %c0_i32_9 : i32
    scf.if %12 {
      %c0_10 = arith.constant 0 : index
      %c0_11 = arith.constant 0 : index
      %13 = vector.load %arg9[%c0_10, %c0_11] : memref<128x128xf32, #tpu.memory_space<vmem>>, vector<128x128xf32>
      %14 = arith.truncf %13 : vector<128x128xf32> to vector<128x128xbf16>
      %c0_12 = arith.constant 0 : index
      %c0_13 = arith.constant 0 : index
      %15 = vector.load %arg4[%c0_12, %c0_13] : memref<128x128xbf16, #tpu.memory_space<vmem>>, vector<128x128xbf16>
      %cst_14 = arith.constant dense<0.000000e+00> : vector<128x128xf32>
      %16 = tpu.matmul %14, %15, %cst_14 {dimension_numbers = #tpu.dot_dimension_numbers<[1], [0], [0], [1], [0, 0, 1, 1], [], []>} : vector<128x128xbf16>, vector<128x128xbf16>, vector<128x128xf32> -> vector<128x128xf32>
      %c0_15 = arith.constant 0 : index
      %c0_16 = arith.constant 0 : index
      %17 = vector.load %arg5[%c0_15, %c0_16] : memref<1x128xf32, #tpu.memory_space<vmem>>, vector<1x128xf32>
      %18 = vector.broadcast %17 : vector<1x128xf32> to vector<128x128xf32>
      %19 = arith.addf %16, %18 : vector<128x128xf32>
      %cst_17 = arith.constant 0.000000e+00 : f32
      %20 = vector.broadcast %cst_17 : f32 to vector<128x128xf32>
      %21 = arith.maximumf %19, %20 : vector<128x128xf32>
      %22 = arith.truncf %21 : vector<128x128xf32> to vector<128x128xbf16>
      %c0_18 = arith.constant 0 : index
      %c0_19 = arith.constant 0 : index
      %23 = vector.load %arg6[%c0_18, %c0_19] : memref<128x128xbf16, #tpu.memory_space<vmem>>, vector<128x128xbf16>
      %cst_20 = arith.constant dense<0.000000e+00> : vector<128x128xf32>
      %24 = tpu.matmul %22, %23, %cst_20 {dimension_numbers = #tpu.dot_dimension_numbers<[1], [0], [0], [1], [0, 0, 1, 1], [], []>} : vector<128x128xbf16>, vector<128x128xbf16>, vector<128x128xf32> -> vector<128x128xf32>
      %c0_21 = arith.constant 0 : index
      %c0_22 = arith.constant 0 : index
      %25 = vector.load %arg7[%c0_21, %c0_22] : memref<1x128xf32, #tpu.memory_space<vmem>>, vector<1x128xf32>
      %26 = vector.broadcast %25 : vector<1x128xf32> to vector<128x128xf32>
      %27 = arith.addf %24, %26 : vector<128x128xf32>
      %cst_23 = arith.constant 0.000000e+00 : f32
      %28 = vector.broadcast %cst_23 : f32 to vector<128x128xf32>
      %29 = arith.maximumf %27, %28 : vector<128x128xf32>
      %30 = arith.truncf %29 : vector<128x128xf32> to vector<128x128xbf16>
      %c0_24 = arith.constant 0 : index
      %c0_25 = arith.constant 0 : index
      %31 = vector.load %arg8[%c0_24, %c0_25] : memref<128x128xbf16, #tpu.memory_space<vmem>>, vector<128x128xbf16>
      tpu.vector_store %arg8[%c0_24, %c0_25], %30 {strides = array<i32>} : memref<128x128xbf16, #tpu.memory_space<vmem>>, vector<128x128xbf16>,
    } else {
    }
    return
  }
  func.func @transform_0(%arg0: i32, %arg1: i32) -> (i32, i32) {
    %c0_i32 = arith.constant 0 : i32
    return %arg0, %arg1 : i32, i32
  }
  func.func @transform_1(%arg0: i32, %arg1: i32) -> (i32, i32) {
    %c0_i32 = arith.constant 0 : i32
    %c0_i32_0 = arith.constant 0 : i32
    return %arg1, %c0_i32 : i32, i32
  }
  func.func @transform_2(%arg0: i32, %arg1: i32) -> (i32, i32) {
    %c0_i32 = arith.constant 0 : i32
    %c0_i32_0 = arith.constant 0 : i32
    %c0_i32_1 = arith.constant 0 : i32
    return %c0_i32, %c0_i32_0 : i32, i32
  }
  func.func @transform_3(%arg0: i32, %arg1: i32) -> (i32, i32) {
    %c0_i32 = arith.constant 0 : i32
    %c0_i32_0 = arith.constant 0 : i32
    %c0_i32_1 = arith.constant 0 : i32
    return %c0_i32, %c0_i32_0 : i32, i32
  }
  func.func @transform_4(%arg0: i32, %arg1: i32) -> (i32, i32) {
    %c0_i32 = arith.constant 0 : i32
    %c0_i32_0 = arith.constant 0 : i32
    %c0_i32_1 = arith.constant 0 : i32
    return %c0_i32, %c0_i32_0 : i32, i32
  }
  func.func @transform_5(%arg0: i32, %arg1: i32) -> (i32, i32) {
    %c0_i32 = arith.constant 0 : i32
    %c0_i32_0 = arith.constant 0 : i32
    %c0_i32_1 = arith.constant 0 : i32
    return %c0_i32, %c0_i32_0 : i32, i32
  }
  func.func @transform_6(%arg0: i32, %arg1: i32) -> (i32, i32) {
    %c0_i32 = arith.constant 0 : i32
    %c0_i32_0 = arith.constant 0 : i32
    return %arg0, %c0_i32 : i32, i32
  }
}

module attributes {stable_mosaic.version = 11 : i64} {
  func.func @_pool_fc_kernel(%arg0: i32, %arg1: memref<32x128xi8, #tpu.memory_space<vmem>>, %arg2: memref<128x128xbf16, #tpu.memory_space<vmem>>, %arg3: memref<32x1xf32, #tpu.memory_space<vmem>>, %arg4: memref<128x128xbf16, #tpu.memory_space<vmem>>, %arg5: memref<1x128xf32, #tpu.memory_space<vmem>>, %arg6: memref<128x128xbf16, #tpu.memory_space<vmem>>, %arg7: memref<1x128xf32, #tpu.memory_space<vmem>>, %arg8: memref<32x128xf32, #tpu.memory_space<vmem>>, %arg9: memref<32x128xf32, #tpu.memory_space<vmem>>) attributes {dimension_semantics = [#tpu.dimension_semantics<arbitrary>], iteration_bounds = array<i64: 1>, scalar_prefetch = 0 : i64, scratch_operands = 1 : i64, tpu.core_type = #tpu.core_type<tc>, window_params = [{transform_indices = @transform_0, window_bounds = array<i64: 32, 128>}, {transform_indices = @transform_1, window_bounds = array<i64: 128, 128>}, {pipeline_mode = #tpu.pipeline_mode<synchronous>, transform_indices = @transform_2, window_bounds = array<i64: 32, 1>}, {pipeline_mode = #tpu.pipeline_mode<synchronous>, transform_indices = @transform_3, window_bounds = array<i64: 128, 128>}, {pipeline_mode = #tpu.pipeline_mode<synchronous>, transform_indices = @transform_4, window_bounds = array<i64: 1, 128>}, {pipeline_mode = #tpu.pipeline_mode<synchronous>, transform_indices = @transform_5, window_bounds = array<i64: 128, 128>}, {pipeline_mode = #tpu.pipeline_mode<synchronous>, transform_indices = @transform_6, window_bounds = array<i64: 1, 128>}, {pipeline_mode = #tpu.pipeline_mode<synchronous>, transform_indices = @transform_7, window_bounds = array<i64: 32, 128>}]} {
    %c0_i32 = arith.constant 0 : i32
    %0 = arith.cmpi eq, %arg0, %c0_i32 : i32
    %1 = arith.extui %0 : i1 to i32
    %c0_i32_0 = arith.constant 0 : i32
    %2 = arith.cmpi ne, %1, %c0_i32_0 : i32
    scf.if %2 {
      %cst_10 = arith.constant 0.000000e+00 : f32
      %13 = vector.broadcast %cst_10 : f32 to vector<32x128xf32>
      %c0_11 = arith.constant 0 : index
      %c0_12 = arith.constant 0 : index
      %14 = vector.load %arg9[%c0_11, %c0_12] : memref<32x128xf32, #tpu.memory_space<vmem>>, vector<32x128xf32>
      tpu.vector_store %arg9[%c0_11, %c0_12], %13 {strides = array<i32>} : memref<32x128xf32, #tpu.memory_space<vmem>>, vector<32x128xf32>,
    } else {
    }
    %c0 = arith.constant 0 : index
    %c0_1 = arith.constant 0 : index
    %3 = vector.load %arg1[%c0, %c0_1] : memref<32x128xi8, #tpu.memory_space<vmem>>, vector<32x128xi8>
    %4 = arith.sitofp %3 : vector<32x128xi8> to vector<32x128xbf16>
    %c0_2 = arith.constant 0 : index
    %c0_3 = arith.constant 0 : index
    %5 = vector.load %arg9[%c0_2, %c0_3] : memref<32x128xf32, #tpu.memory_space<vmem>>, vector<32x128xf32>
    %c0_4 = arith.constant 0 : index
    %c0_5 = arith.constant 0 : index
    %6 = vector.load %arg2[%c0_4, %c0_5] : memref<128x128xbf16, #tpu.memory_space<vmem>>, vector<128x128xbf16>
    %cst = arith.constant dense<0.000000e+00> : vector<32x128xf32>
    %7 = tpu.matmul %4, %6, %cst {dimension_numbers = #tpu.dot_dimension_numbers<[1], [0], [0], [1], [0, 0, 1, 1], [], []>} : vector<32x128xbf16>, vector<128x128xbf16>, vector<32x128xf32> -> vector<32x128xf32>
    %8 = arith.addf %5, %7 : vector<32x128xf32>
    %c0_6 = arith.constant 0 : index
    %c0_7 = arith.constant 0 : index
    %9 = vector.load %arg9[%c0_6, %c0_7] : memref<32x128xf32, #tpu.memory_space<vmem>>, vector<32x128xf32>
    tpu.vector_store %arg9[%c0_6, %c0_7], %8 {strides = array<i32>} : memref<32x128xf32, #tpu.memory_space<vmem>>, vector<32x128xf32>,
    %c0_i32_8 = arith.constant 0 : i32
    %10 = arith.cmpi eq, %arg0, %c0_i32_8 : i32
    %11 = arith.extui %10 : i1 to i32
    %c0_i32_9 = arith.constant 0 : i32
    %12 = arith.cmpi ne, %11, %c0_i32_9 : i32
    scf.if %12 {
      %c0_10 = arith.constant 0 : index
      %c0_11 = arith.constant 0 : index
      %13 = vector.load %arg9[%c0_10, %c0_11] : memref<32x128xf32, #tpu.memory_space<vmem>>, vector<32x128xf32>
      %c0_12 = arith.constant 0 : index
      %c0_13 = arith.constant 0 : index
      %14 = vector.load %arg3[%c0_12, %c0_13] : memref<32x1xf32, #tpu.memory_space<vmem>>, vector<32x1xf32>
      %15 = vector.broadcast %14 : vector<32x1xf32> to vector<32x128xf32>
      %16 = arith.mulf %13, %15 : vector<32x128xf32>
      %17 = arith.truncf %16 : vector<32x128xf32> to vector<32x128xbf16>
      %c0_14 = arith.constant 0 : index
      %c0_15 = arith.constant 0 : index
      %18 = vector.load %arg4[%c0_14, %c0_15] : memref<128x128xbf16, #tpu.memory_space<vmem>>, vector<128x128xbf16>
      %cst_16 = arith.constant dense<0.000000e+00> : vector<32x128xf32>
      %19 = tpu.matmul %17, %18, %cst_16 {dimension_numbers = #tpu.dot_dimension_numbers<[1], [0], [0], [1], [0, 0, 1, 1], [], []>} : vector<32x128xbf16>, vector<128x128xbf16>, vector<32x128xf32> -> vector<32x128xf32>
      %c0_17 = arith.constant 0 : index
      %c0_18 = arith.constant 0 : index
      %20 = vector.load %arg5[%c0_17, %c0_18] : memref<1x128xf32, #tpu.memory_space<vmem>>, vector<1x128xf32>
      %21 = vector.broadcast %20 : vector<1x128xf32> to vector<32x128xf32>
      %22 = arith.addf %19, %21 : vector<32x128xf32>
      %cst_19 = arith.constant 0.000000e+00 : f32
      %23 = vector.broadcast %cst_19 : f32 to vector<32x128xf32>
      %24 = arith.maximumf %22, %23 : vector<32x128xf32>
      %25 = arith.truncf %24 : vector<32x128xf32> to vector<32x128xbf16>
      %c0_20 = arith.constant 0 : index
      %c0_21 = arith.constant 0 : index
      %26 = vector.load %arg6[%c0_20, %c0_21] : memref<128x128xbf16, #tpu.memory_space<vmem>>, vector<128x128xbf16>
      %cst_22 = arith.constant dense<0.000000e+00> : vector<32x128xf32>
      %27 = tpu.matmul %25, %26, %cst_22 {dimension_numbers = #tpu.dot_dimension_numbers<[1], [0], [0], [1], [0, 0, 1, 1], [], []>} : vector<32x128xbf16>, vector<128x128xbf16>, vector<32x128xf32> -> vector<32x128xf32>
      %c0_23 = arith.constant 0 : index
      %c0_24 = arith.constant 0 : index
      %28 = vector.load %arg7[%c0_23, %c0_24] : memref<1x128xf32, #tpu.memory_space<vmem>>, vector<1x128xf32>
      %29 = vector.broadcast %28 : vector<1x128xf32> to vector<32x128xf32>
      %30 = arith.addf %27, %29 : vector<32x128xf32>
      %c0_25 = arith.constant 0 : index
      %c0_26 = arith.constant 0 : index
      %31 = vector.load %arg8[%c0_25, %c0_26] : memref<32x128xf32, #tpu.memory_space<vmem>>, vector<32x128xf32>
      tpu.vector_store %arg8[%c0_25, %c0_26], %30 {strides = array<i32>} : memref<32x128xf32, #tpu.memory_space<vmem>>, vector<32x128xf32>,
    } else {
    }
    return
  }
  func.func @transform_0(%arg0: i32) -> (i32, i32) {
    %c0_i32 = arith.constant 0 : i32
    %c0_i32_0 = arith.constant 0 : i32
    return %c0_i32, %arg0 : i32, i32
  }
  func.func @transform_1(%arg0: i32) -> (i32, i32) {
    %c0_i32 = arith.constant 0 : i32
    %c0_i32_0 = arith.constant 0 : i32
    return %arg0, %c0_i32 : i32, i32
  }
  func.func @transform_2(%arg0: i32) -> (i32, i32) {
    %c0_i32 = arith.constant 0 : i32
    %c0_i32_0 = arith.constant 0 : i32
    %c0_i32_1 = arith.constant 0 : i32
    return %c0_i32, %c0_i32_0 : i32, i32
  }
  func.func @transform_3(%arg0: i32) -> (i32, i32) {
    %c0_i32 = arith.constant 0 : i32
    %c0_i32_0 = arith.constant 0 : i32
    %c0_i32_1 = arith.constant 0 : i32
    return %c0_i32, %c0_i32_0 : i32, i32
  }
  func.func @transform_4(%arg0: i32) -> (i32, i32) {
    %c0_i32 = arith.constant 0 : i32
    %c0_i32_0 = arith.constant 0 : i32
    %c0_i32_1 = arith.constant 0 : i32
    return %c0_i32, %c0_i32_0 : i32, i32
  }
  func.func @transform_5(%arg0: i32) -> (i32, i32) {
    %c0_i32 = arith.constant 0 : i32
    %c0_i32_0 = arith.constant 0 : i32
    %c0_i32_1 = arith.constant 0 : i32
    return %c0_i32, %c0_i32_0 : i32, i32
  }
  func.func @transform_6(%arg0: i32) -> (i32, i32) {
    %c0_i32 = arith.constant 0 : i32
    %c0_i32_0 = arith.constant 0 : i32
    %c0_i32_1 = arith.constant 0 : i32
    return %c0_i32, %c0_i32_0 : i32, i32
  }
  func.func @transform_7(%arg0: i32) -> (i32, i32) {
    %c0_i32 = arith.constant 0 : i32
    %c0_i32_0 = arith.constant 0 : i32
    %c0_i32_1 = arith.constant 0 : i32
    return %c0_i32, %c0_i32_0 : i32, i32
  }
}

</mosaic_0001>

<bundles_post_ra>
// kernel: gin_mlp_forward.3
= control target key start
LH: loop header
LB: loop body
LE: loop exit
PB: predicated region body
PF: predicated region fallthrough
CT: control target
= control target key end

     0   :  { %s1302_s1 = inlined_call_operand.vmem [shape: bf16[128,128], index: 1, kind: input, shape index: {}]   ;;  %s1303_s0 = inlined_call_operand.vmem [shape: s8[128,128], index: 0, kind: input, shape index: {}]   ;;  %s1304_s2 = inlined_call_operand.vmem [shape: bf16[128,128], index: 2, kind: input, shape index: {}]   ;;  %s1305_s4 = inlined_call_operand.vmem [shape: bf16[128,128], index: 4, kind: input, shape index: {}]   ;;  %s1306_s3 = inlined_call_operand.vmem [shape: f32[1,128], index: 3, kind: input, shape index: {}]   ;;  %s1307_s5 = inlined_call_operand.vmem [shape: f32[1,128], index: 5, kind: input, shape index: {}]   ;;  %s1308_s6 = inlined_call_operand.vmem [shape: bf16[128,128], index: 6, kind: output, shape index: {}]  }
   0x1   :  { %v1093_v0 = vld [vmem:[%s1302_s1 + $0x38] sm:$0xff]   ;;  %v1094_v1 = vld [vmem:[%s1302_s1 + $0x30] sm:$0xff]   ;;  %v1095_v2 = vld [vmem:[%s1302_s1 + $0x28] sm:$0xff]  }
   0x2   :  { %981 = vmatprep.subr.bf16.mxu0 %v1093_v0  ;;  %v1096_v3 = vld [vmem:[%s1302_s1 + $0x20] sm:$0xff]   ;;  %v1097_v9 = vld [vmem:[%s1302_s1 + $0x18] sm:$0xff]   ;;  %v1102_v11 = vld [vmem:[%s1304_s2 + $0x30] sm:$0xff]  }
   0x3   :  { %982 = vmatpush3.bf16.msra.mxu0 %v1093_v0  ;;  %v44_v4 = vld [vmem:[%s1303_s0] sm:$0x3]  ;;  %v45_v5 = vld [vmem:[%s1303_s0 + $0x2] sm:$0x3]  ;;  %v1101_v10 = vld [vmem:[%s1304_s2 + $0x38] sm:$0xff]  }
   0x4   :  { %983 = vmatprep.subr.bf16.mxu0 %v1094_v1  ;;  %v60_v6 = vunpack.c.l.s8.bf16 %v44_v4  ;;  %v61_v7 = vunpack.c.l.s8.bf16 %v45_v5  ;;  %v1098_v12 = vld [vmem:[%s1302_s1 + $0x10] sm:$0xff]   ;;  %1013 = vmatprep.subr.bf16.mxu1 %v1101_v10  ;;  %v1103_v13 = vld [vmem:[%s1304_s2 + $0x28] sm:$0xff]   ;;  %v1104_v15 = vld [vmem:[%s1304_s2 + $0x20] sm:$0xff]  }
   0x5   :  { %1014 = vmatpush3.bf16.msra.mxu1 %v1101_v10  ;;  %v1099_v14 = vld [vmem:[%s1302_s1 + $0x8] sm:$0xff]   ;;  %v46_v16 = vld [vmem:[%s1303_s0 + $0x4] sm:$0x3]  ;;  %v47_v17 = vld [vmem:[%s1303_s0 + $0x6] sm:$0x3] }
   0x6   :  { %v820_v8 = vcombine.low %v60_v6, %v61_v7  ;;  %1015 = vmatprep.subr.bf16.mxu1 %v1102_v11  ;;  %v1100_v18 = vld [vmem:[%s1302_s1] sm:$0xff]   ;;  %v48_v19 = vld [vmem:[%s1303_s0 + $0x8] sm:$0x3]  ;;  %v49_v20 = vld [vmem:[%s1303_s0 + $0xa] sm:$0x3]  ;;  %v62_v21 = vunpack.c.l.s8.bf16 %v46_v16  ;;  %v63_v22 = vunpack.c.l.s8.bf16 %v47_v17 }
   0x7   :  { %984 = vmatpush3.bf16.msra.mxu0 %v1094_v1  ;;  %v1105_v23 = vld [vmem:[%s1304_s2 + $0x18] sm:$0xff]   ;;  %v64_v24 = vunpack.c.l.s8.bf16 %v48_v19  ;;  %v65_v25 = vunpack.c.l.s8.bf16 %v49_v20  ;;  %v1106_v27 = vld [vmem:[%s1304_s2 + $0x10] sm:$0xff]   ;;  %v50_v29 = vld [vmem:[%s1303_s0 + $0xc] sm:$0x3] }
   0x8   :  { %985 = vmatprep.subr.bf16.mxu0 %v1095_v2  ;;  %997 = vmatprep.mubr.bf16.mxu0 %v820_v8  ;;  %v821_v26 = vcombine.low %v62_v21, %v63_v22  ;;  %v51_v30 = vld [vmem:[%s1303_s0 + $0xe] sm:$0x3]  ;;  %v52_v31 = vld [vmem:[%s1303_s0 + $0x10] sm:$0x3]  ;;  %v53_v32 = vld [vmem:[%s1303_s0 + $0x12] sm:$0x3]  ;;  %v66_v33 = vunpack.c.l.s8.bf16 %v50_v29 }
   0x9   :  { %1016 = vmatpush3.bf16.msra.mxu1 %v1102_v11  ;;  %v822_v28 = vcombine.low %v64_v24, %v65_v25  ;;  %v67_v34 = vunpack.c.l.s8.bf16 %v51_v30  ;;  %v68_v35 = vunpack.c.l.s8.bf16 %v52_v31  ;;  %v69_v36 = vunpack.c.l.s8.bf16 %v53_v32  ;;  %v54_v39 = vld [vmem:[%s1303_s0 + $0x14] sm:$0x3]  ;;  %v55_v40 = vld [vmem:[%s1303_s0 + $0x16] sm:$0x3]  ;;  %v56_v41 = vld [vmem:[%s1303_s0 + $0x18] sm:$0x3] }
   0xa   :  { %1017 = vmatprep.subr.bf16.mxu1 %v1103_v13  ;;  %v57_v42 = vld [vmem:[%s1303_s0 + $0x1a] sm:$0x3]  ;;  %v70_v43 = vunpack.c.l.s8.bf16 %v54_v39  ;;  %v71_v44 = vunpack.c.l.s8.bf16 %v55_v40  ;;  %v72_v45 = vunpack.c.l.s8.bf16 %v56_v41  ;;  %v58_v49 = vld [vmem:[%s1303_s0 + $0x1c] sm:$0x3]  ;;  %v59_v50 = vld [vmem:[%s1303_s0 + $0x1e] sm:$0x3] }
   0xb   :  { %986 = vmatpush3.bf16.msra.mxu0 %v1095_v2  ;;  %v823_v37 = vcombine.low %v66_v33, %v67_v34  ;;  %v824_v38 = vcombine.low %v68_v35, %v69_v36  ;;  %v73_v46 = vunpack.c.l.s8.bf16 %v57_v42  ;;  %v74_v51 = vunpack.c.l.s8.bf16 %v58_v49  ;;  %v1107_v54 = vld [vmem:[%s1304_s2 + $0x8] sm:$0xff]   ;;  %v1108_v55 = vld [vmem:[%s1304_s2] sm:$0xff]   ;;  %v1109_v56 = vld [vmem:[%s1305_s4 + $0x38] sm:$0xff]  }
   0xc   :  { %987 = vmatprep.subr.bf16.mxu0 %v1096_v3  ;;  %v825_v47 = vcombine.low %v70_v43, %v71_v44  ;;  %v75_v52 = vunpack.c.l.s8.bf16 %v59_v50  ;;  %v1110_v57 = vld [vmem:[%s1305_s4 + $0x30] sm:$0xff]   ;;  %v1111_v58 = vld [vmem:[%s1305_s4 + $0x28] sm:$0xff]   ;;  %v1112_v59 = vld [vmem:[%s1305_s4 + $0x20] sm:$0xff]  }
   0xd   :  { %1018 = vmatpush3.bf16.msra.mxu1 %v1103_v13  ;;  %v826_v48 = vcombine.low %v72_v45, %v73_v46  ;;  %v1113_v60 = vld [vmem:[%s1305_s4 + $0x18] sm:$0xff]   ;;  %v1114_v21 = vld [vmem:[%s1305_s4 + $0x10] sm:$0xff]   ;;  %v1115_v22 = vld [vmem:[%s1305_s4 + $0x8] sm:$0xff]  }
   0xe   :  { %1019 = vmatprep.subr.bf16.mxu1 %v1104_v15  ;;  %v827_v53 = vcombine.low %v74_v51, %v75_v52 }
   0xf   :  { %988 = vmatpush3.bf16.msra.mxu0 %v1096_v3 }
  0x10   :  { %989 = vmatprep.subr.bf16.mxu0 %v1097_v9 }
  0x11   :  { %1020 = vmatpush3.bf16.msra.mxu1 %v1104_v15 }
  0x12   :  { %1021 = vmatprep.subr.bf16.mxu1 %v1105_v23 }
  0x13   :  { %990 = vmatpush3.bf16.msra.mxu0 %v1097_v9 }
  0x14   :  { %991 = vmatprep.subr.bf16.mxu0 %v1098_v12 }
  0x15   :  { %1022 = vmatpush3.bf16.msra.mxu1 %v1105_v23  ;;  %v1116_v23 = vld [vmem:[%s1305_s4] sm:$0xff]  }
  0x16   :  { %1023 = vmatprep.subr.bf16.mxu1 %v1106_v27 }
  0x17   :  { %992 = vmatpush3.bf16.msra.mxu0 %v1098_v12 }
  0x18   :  { %993 = vmatprep.subr.bf16.mxu0 %v1099_v14 }
  0x19   :  { %1024 = vmatpush3.bf16.msra.mxu1 %v1106_v27 }
  0x1a   :  { %1025 = vmatprep.subr.bf16.mxu1 %v1107_v54 }
  0x1b   :  { %994 = vmatpush3.bf16.msra.mxu0 %v1099_v14 }
  0x1c   :  { %995 = vmatprep.subr.bf16.mxu0 %v1100_v18 }
  0x1d   :  { %1026 = vmatpush3.bf16.msra.mxu1 %v1107_v54 }
  0x1e   :  { %1027 = vmatprep.subr.bf16.mxu1 %v1108_v55 }
  0x1f   :  { %996 = vmatpush3.bf16.msra.mxu0 %v1100_v18 }
  0x20   :  { %1045 = vmatprep.subr.bf16.mxu0 %v1109_v56 }
  0x21   :  { %1028 = vmatpush3.bf16.msra.mxu1 %v1108_v55 }
  0x22   :  { %998 = vmatmul.mubr.bf16.vlgmr.msra.gmra.mxu0 %v821_v26  ;;  %1077 = vmatprep.subr.bf16.mxu1 %v1109_v56  ;;  %v836_v26 = vld [vmem:[%s1306_s3] ss:$0 sm:$0xff] }
  0x23   :  { %1001 = vmatprep.mubr.bf16.mxu0 %v822_v28  ;;  %1046 = vmatpush3.bf16.msra.mxu0 %v1109_v56 }
  0x24   :  { %1047 = vmatprep.subr.bf16.mxu0 %v1110_v57 }
  0x27   :  { %1048 = vmatpush3.bf16.msra.mxu0 %v1110_v57 }
  0x28   :  { %1049 = vmatprep.subr.bf16.mxu0 %v1111_v58 }
  0x2a   :  { %1002 = vmatmul.mubr.bf16.gmra.mxu0 %v823_v37 }
  0x2b   :  { %1005 = vmatprep.mubr.bf16.mxu0 %v824_v38  ;;  %1050 = vmatpush3.bf16.msra.mxu0 %v1111_v58 }
  0x2c   :  { %1051 = vmatprep.subr.bf16.mxu0 %v1112_v59 }
  0x2f   :  { %1052 = vmatpush3.bf16.msra.mxu0 %v1112_v59 }
  0x30   :  { %1053 = vmatprep.subr.bf16.mxu0 %v1113_v60 }
  0x32   :  { %1006 = vmatmul.mubr.bf16.gmra.mxu0 %v825_v47 }
  0x33   :  { %1009 = vmatprep.mubr.bf16.mxu0 %v826_v48  ;;  %1054 = vmatpush3.bf16.msra.mxu0 %v1113_v60 }
  0x34   :  { %1055 = vmatprep.subr.bf16.mxu0 %v1114_v21 }
  0x37   :  { %1056 = vmatpush3.bf16.msra.mxu0 %v1114_v21 }
  0x38   :  { %1057 = vmatprep.subr.bf16.mxu0 %v1115_v22 }
  0x3a   :  { %1010 = vmatmul.mubr.bf16.gmra.mxu0 %v827_v53 }
  0x3b   :  { %1058 = vmatpush3.bf16.msra.mxu0 %v1115_v22 }
  0x3c   :  { %1059 = vmatprep.subr.bf16.mxu0 %v1116_v23 }
  0x3f   :  { %1060 = vmatpush3.bf16.msra.mxu0 %v1116_v23 }
  0xe2   :  { %v999_v61 = vpop.f32.mrf.mxu0 }
  0xe4   :  { %v238_v62 = vpop.f32.mrf.mxu0 }
  0xe6   :  { %v1000_v63 = vpop.f32.mrf.mxu0 }
  0xe7   :  { %v353_v2 = vpack.c.bf16 %v1000_v63, %v999_v61 }
  0xe8   :  { %v241_v0 = vpop.f32.mrf.mxu0 }
  0xe9   :  { %v352_v1 = vpack.c.bf16 %v241_v0, %v238_v62 }
  0xea   :  { %v1003_v3 = vpop.f32.mrf.mxu0 }
  0xeb   :  { %1029 = vmatprep.mubr.bf16.mxu1 %v352_v1 }
  0xec   :  { %v254_v4 = vpop.f32.mrf.mxu0  ;;  %1030 = vmatmul.mubr.bf16.vlgmr.msra.gmra.mxu1 %v353_v2 }
  0xed   :  { %1085 = vmatpush3.bf16.msra.mxu1 %v1109_v56 }
  0xee   :  { %v1004_v5 = vpop.f32.mrf.mxu0  ;;  %1078 = vmatprep.subr.bf16.mxu1 %v1110_v57 }
  0xef   :  { %v355_v8 = vpack.c.bf16 %v1004_v5, %v1003_v3 }
  0xf0   :  { %v257_v6 = vpop.f32.mrf.mxu0 }
  0xf1   :  { %v354_v7 = vpack.c.bf16 %v257_v6, %v254_v4  ;;  %1086 = vmatpush3.bf16.msra.mxu1 %v1110_v57 }
  0xf2   :  { %v1007_v9 = vpop.f32.mrf.mxu0  ;;  %1079 = vmatprep.subr.bf16.mxu1 %v1111_v58 }
  0xf3   :  { %1033 = vmatprep.mubr.bf16.mxu1 %v354_v7 }
  0xf4   :  { %v270_v10 = vpop.f32.mrf.mxu0  ;;  %1034 = vmatmul.mubr.bf16.gmra.mxu1 %v355_v8 }
  0xf5   :  { %1087 = vmatpush3.bf16.msra.mxu1 %v1111_v58 }
  0xf6   :  { %v1008_v11 = vpop.f32.mrf.mxu0  ;;  %1080 = vmatprep.subr.bf16.mxu1 %v1112_v59 }
  0xf7   :  { %v357_v14 = vpack.c.bf16 %v1008_v11, %v1007_v9 }
  0xf8   :  { %v273_v12 = vpop.f32.mrf.mxu0 }
  0xf9   :  { %v356_v13 = vpack.c.bf16 %v273_v12, %v270_v10  ;;  %1088 = vmatpush3.bf16.msra.mxu1 %v1112_v59 }
  0xfa   :  { %v1011_v15 = vpop.f32.mrf.mxu0  ;;  %1081 = vmatprep.subr.bf16.mxu1 %v1113_v60 }
  0xfb   :  { %1037 = vmatprep.mubr.bf16.mxu1 %v356_v13 }
  0xfc   :  { %v286_v16 = vpop.f32.mrf.mxu0  ;;  %1038 = vmatmul.mubr.bf16.gmra.mxu1 %v357_v14 }
  0xfd   :  { %1089 = vmatpush3.bf16.msra.mxu1 %v1113_v60 }
  0xfe   :  { %v1012_v17 = vpop.f32.mrf.mxu0  ;;  %1082 = vmatprep.subr.bf16.mxu1 %v1114_v21 }
  0xff   :  { %v359_v20 = vpack.c.bf16 %v1012_v17, %v1011_v15 }
 0x100   :  { %v289_v18 = vpop.f32.mrf.mxu0 }
 0x101   :  { %v358_v19 = vpack.c.bf16 %v289_v18, %v286_v16  ;;  %1090 = vmatpush3.bf16.msra.mxu1 %v1114_v21  ;;  %v845_v18 = vld [vmem:[%s1307_s5] ss:$0 sm:$0xff] }
 0x102   :  { %1083 = vmatprep.subr.bf16.mxu1 %v1115_v22 }
 0x103   :  { %1041 = vmatprep.mubr.bf16.mxu1 %v358_v19 }
 0x104   :  { %1042 = vmatmul.mubr.bf16.gmra.mxu1 %v359_v20 }
 0x105   :  { %1091 = vmatpush3.bf16.msra.mxu1 %v1115_v22 }
 0x106   :  { %1084 = vmatprep.subr.bf16.mxu1 %v1116_v23 }
 0x109   :  { %1092 = vmatpush3.bf16.msra.mxu1 %v1116_v23 }
 0x1ac   :  { %v1031_v24 = vpop.f32.mrf.mxu1 }
 0x1ad   :  { %v474_v30 = vadd.f32 %v1031_v24, %v836_v26 }
 0x1ae   :  { %v465_v25 = vpop.f32.mrf.mxu1 }
 0x1af   :  { %v466_v28 = vadd.f32 %v836_v26, %v465_v25  ;;  %v530_v37 = vmax.f32 %v474_v30, 0.0 }
 0x1b0   :  { %v1032_v27 = vpop.f32.mrf.mxu1 }
 0x1b1   :  { %v477_v29 = vadd.f32 %v1032_v27, %v836_v26  ;;  %v528_v35 = vmax.f32 %v466_v28, 0.0 }
 0x1b2   :  { %v468_v31 = vpop.f32.mrf.mxu1 }
 0x1b3   :  { %v469_v32 = vadd.f32 %v836_v26, %v468_v31  ;;  %v531_v33 = vmax.f32 %v477_v29, 0.0 }
 0x1b4   :  { %v1035_v34 = vpop.f32.mrf.mxu1 }
 0x1b5   :  { %v529_v36 = vmax.f32 %v469_v32, 0.0  ;;  %v545_v40 = vpack.c.bf16 %v531_v33, %v530_v37  ;;  %v490_v44 = vadd.f32 %v1035_v34, %v836_v26 }
 0x1b6   :  { %v481_v38 = vpop.f32.mrf.mxu1 }
 0x1b7   :  { %v544_v39 = vpack.c.bf16 %v529_v36, %v528_v35  ;;  %v482_v42 = vadd.f32 %v836_v26, %v481_v38  ;;  %v534_v51 = vmax.f32 %v490_v44, 0.0 }
 0x1b8   :  { %v1036_v41 = vpop.f32.mrf.mxu1 }
 0x1b9   :  { %v493_v43 = vadd.f32 %v1036_v41, %v836_v26  ;;  %1061 = vmatprep.mubr.bf16.mxu0 %v544_v39  ;;  %v532_v49 = vmax.f32 %v482_v42, 0.0 }
 0x1ba   :  { %v484_v45 = vpop.f32.mrf.mxu1  ;;  %1062 = vmatmul.mubr.bf16.vlgmr.msra.gmra.mxu0 %v545_v40 }
 0x1bb   :  { %v485_v46 = vadd.f32 %v836_v26, %v484_v45  ;;  %v535_v47 = vmax.f32 %v493_v43, 0.0 }
 0x1bc   :  { %v1039_v48 = vpop.f32.mrf.mxu1 }
 0x1bd   :  { %v533_v50 = vmax.f32 %v485_v46, 0.0  ;;  %v547_v54 = vpack.c.bf16 %v535_v47, %v534_v51  ;;  %v506_v58 = vadd.f32 %v1039_v48, %v836_v26 }
 0x1be   :  { %v497_v52 = vpop.f32.mrf.mxu1 }
 0x1bf   :  { %v546_v53 = vpack.c.bf16 %v533_v50, %v532_v49  ;;  %v498_v56 = vadd.f32 %v836_v26, %v497_v52  ;;  %v538_v1 = vmax.f32 %v506_v58, 0.0 }
 0x1c0   :  { %v1040_v55 = vpop.f32.mrf.mxu1 }
 0x1c1   :  { %v509_v57 = vadd.f32 %v1040_v55, %v836_v26  ;;  %1065 = vmatprep.mubr.bf16.mxu0 %v546_v53  ;;  %v536_v63 = vmax.f32 %v498_v56, 0.0 }
 0x1c2   :  { %v500_v59 = vpop.f32.mrf.mxu1  ;;  %1066 = vmatmul.mubr.bf16.gmra.mxu0 %v547_v54 }
 0x1c3   :  { %v501_v60 = vadd.f32 %v836_v26, %v500_v59  ;;  %v539_v61 = vmax.f32 %v509_v57, 0.0 }
 0x1c4   :  { %v1043_v62 = vpop.f32.mrf.mxu1 }
 0x1c5   :  { %v537_v0 = vmax.f32 %v501_v60, 0.0  ;;  %v549_v4 = vpack.c.bf16 %v539_v61, %v538_v1  ;;  %v522_v8 = vadd.f32 %v1043_v62, %v836_v26 }
 0x1c6   :  { %v513_v2 = vpop.f32.mrf.mxu1 }
 0x1c7   :  { %v548_v3 = vpack.c.bf16 %v537_v0, %v536_v63  ;;  %v514_v6 = vadd.f32 %v836_v26, %v513_v2  ;;  %v542_v14 = vmax.f32 %v522_v8, 0.0 }
 0x1c8   :  { %v1044_v5 = vpop.f32.mrf.mxu1 }
 0x1c9   :  { %v525_v7 = vadd.f32 %v1044_v5, %v836_v26  ;;  %1069 = vmatprep.mubr.bf16.mxu1 %v548_v3  ;;  %v540_v12 = vmax.f32 %v514_v6, 0.0 }
 0x1ca   :  { %v516_v9 = vpop.f32.mrf.mxu1  ;;  %1070 = vmatmul.mubr.bf16.vlgmr.msra.gmra.mxu1 %v549_v4 }
 0x1cb   :  { %v517_v10 = vadd.f32 %v836_v26, %v516_v9  ;;  %v543_v11 = vmax.f32 %v525_v7, 0.0 }
 0x1cd   :  { %v541_v13 = vmax.f32 %v517_v10, 0.0  ;;  %v551_v16 = vpack.c.bf16 %v543_v11, %v542_v14 }
 0x1cf   :  { %v550_v15 = vpack.c.bf16 %v541_v13, %v540_v12 }
 0x1d1   :  { %1073 = vmatprep.mubr.bf16.mxu1 %v550_v15 }
 0x1d2   :  { %1074 = vmatmul.mubr.bf16.gmra.mxu1 %v551_v16 }
 0x27a   :  { %v1063_v17 = vpop.f32.mrf.mxu0 }
 0x27b   :  { %v666_v20 = vadd.f32 %v1063_v17, %v845_v18 }
 0x27c   :  { %v657_v19 = vpop.f32.mrf.mxu0 }
 0x27d   :  { %v658_v22 = vadd.f32 %v845_v18, %v657_v19  ;;  %v722_v25 = vmax.f32 %v666_v20, 0.0 }
 0x27e   :  { %v1064_v21 = vpop.f32.mrf.mxu0 }
 0x27f   :  { %v669_v23 = vadd.f32 %v1064_v21, %v845_v18  ;;  %v720_v29 = vmax.f32 %v658_v22, 0.0 }
 0x280   :  { %v660_v24 = vpop.f32.mrf.mxu0 }
 0x281   :  { %v723_v26 = vmax.f32 %v669_v23, 0.0  ;;  %v661_v27 = vadd.f32 %v845_v18, %v660_v24 }
 0x282   :  { %v1067_v28 = vpop.f32.mrf.mxu0 }
 0x283   :  { %v894_v30 = vpack.c.bf16 %v723_v26, %v722_v25  ;;  %v721_v31 = vmax.f32 %v661_v27, 0.0  ;;  %v682_v34 = vadd.f32 %v1067_v28, %v845_v18 }
 0x284   :  { %v673_v32 = vpop.f32.mrf.mxu0 }
 0x285   :  { %926 = vst [vmem:[%s1308_s6 + $0x8] sm:$0xff] %v894_v30   ;;  %v889_v33 = vpack.c.bf16 %v721_v31, %v720_v29  ;;  %v674_v36 = vadd.f32 %v845_v18, %v673_v32  ;;  %v726_v39 = vmax.f32 %v682_v34, 0.0 }
 0x286   :  { %v1068_v35 = vpop.f32.mrf.mxu0 }
 0x287   :  { %890 = vst [vmem:[%s1308_s6] sm:$0xff] %v889_v33   ;;  %v685_v37 = vadd.f32 %v1068_v35, %v845_v18  ;;  %v724_v43 = vmax.f32 %v674_v36, 0.0 }
 0x288   :  { %v676_v38 = vpop.f32.mrf.mxu0 }
 0x289   :  { %v727_v40 = vmax.f32 %v685_v37, 0.0  ;;  %v677_v41 = vadd.f32 %v845_v18, %v676_v38 }
 0x28a   :  { %v1071_v42 = vpop.f32.mrf.mxu1 }
 0x28b   :  { %v904_v44 = vpack.c.bf16 %v727_v40, %v726_v39  ;;  %v725_v45 = vmax.f32 %v677_v41, 0.0  ;;  %v698_v48 = vadd.f32 %v1071_v42, %v845_v18 }
 0x28c   :  { %v689_v46 = vpop.f32.mrf.mxu1 }
 0x28d   :  { %928 = vst [vmem:[%s1308_s6 + $0x18] sm:$0xff] %v904_v44   ;;  %v899_v47 = vpack.c.bf16 %v725_v45, %v724_v43  ;;  %v690_v50 = vadd.f32 %v845_v18, %v689_v46  ;;  %v730_v53 = vmax.f32 %v698_v48, 0.0 }
 0x28e   :  { %v1072_v49 = vpop.f32.mrf.mxu1 }
 0x28f   :  { %927 = vst [vmem:[%s1308_s6 + $0x10] sm:$0xff] %v899_v47   ;;  %v701_v51 = vadd.f32 %v1072_v49, %v845_v18  ;;  %v728_v57 = vmax.f32 %v690_v50, 0.0 }
 0x290   :  { %v692_v52 = vpop.f32.mrf.mxu1 }
 0x291   :  { %v731_v54 = vmax.f32 %v701_v51, 0.0  ;;  %v693_v55 = vadd.f32 %v845_v18, %v692_v52 }
 0x292   :  { %v1075_v56 = vpop.f32.mrf.mxu1 }
 0x293   :  { %v914_v58 = vpack.c.bf16 %v731_v54, %v730_v53  ;;  %v729_v59 = vmax.f32 %v693_v55, 0.0  ;;  %v714_v62 = vadd.f32 %v1075_v56, %v845_v18 }
 0x294   :  { %v705_v60 = vpop.f32.mrf.mxu1 }
 0x295   :  { %930 = vst [vmem:[%s1308_s6 + $0x28] sm:$0xff] %v914_v58   ;;  %v909_v61 = vpack.c.bf16 %v729_v59, %v728_v57  ;;  %v706_v0 = vadd.f32 %v845_v18, %v705_v60  ;;  %v734_v3 = vmax.f32 %v714_v62, 0.0 }
 0x296   :  { %v1076_v63 = vpop.f32.mrf.mxu1 }
 0x297   :  { %929 = vst [vmem:[%s1308_s6 + $0x20] sm:$0xff] %v909_v61   ;;  %v717_v1 = vadd.f32 %v1076_v63, %v845_v18  ;;  %v732_v6 = vmax.f32 %v706_v0, 0.0 }
 0x298   :  { %v708_v2 = vpop.f32.mrf.mxu1 }
 0x299   :  { %v735_v4 = vmax.f32 %v717_v1, 0.0  ;;  %v709_v5 = vadd.f32 %v845_v18, %v708_v2 }
 0x29b   :  { %v924_v7 = vpack.c.bf16 %v735_v4, %v734_v3  ;;  %v733_v8 = vmax.f32 %v709_v5, 0.0 }
 0x29d   :  { %932 = vst [vmem:[%s1308_s6 + $0x38] sm:$0xff] %v924_v7   ;;  %v919_v9 = vpack.c.bf16 %v733_v8, %v732_v6 }
 0x29f   :  { %931 = vst [vmem:[%s1308_s6 + $0x30] sm:$0xff] %v919_v9  }

// kernel: gin_mlp_forward.5
= control target key start
LH: loop header
LB: loop body
LE: loop exit
PB: predicated region body
PF: predicated region fallthrough
CT: control target
= control target key end

     0   :  { %v597_v1 = vmov 0   ;;  %s743_s1 = inlined_call_operand.vmem [shape: bf16[128,128], index: 1, kind: input, shape index: {}]   ;;  %s744_s0 = inlined_call_operand.vmem [shape: s8[32,128], index: 0, kind: input, shape index: {}]   ;;  %s745_s2 = inlined_call_operand.vmem [shape: f32[32,1], index: 2, kind: input, shape index: {}]   ;;  %s746_s3 = inlined_call_operand.vmem [shape: bf16[128,128], index: 3, kind: input, shape index: {}]   ;;  %s747_s5 = inlined_call_operand.vmem [shape: bf16[128,128], index: 5, kind: input, shape index: {}]   ;;  %s748_s4 = inlined_call_operand.vmem [shape: f32[1,128], index: 4, kind: input, shape index: {}]   ;;  %s749_s6 = inlined_call_operand.vmem [shape: f32[1,128], index: 6, kind: input, shape index: {}]   ;;  %s750_s7 = inlined_call_operand.vmem [shape: f32[32,128], index: 7, kind: output, shape index: {}]  }
   0x1   :  { %v573_v0 = vld [vmem:[%s743_s1 + $0x38] sm:$0xff]   ;;  %571 = vset.pattern.permute.xlu0 %v597_v1  ;;  %572 = vset.pattern.permute.xlu1 %v597_v1  ;;  %v574_v2 = vld [vmem:[%s743_s1 + $0x30] sm:$0xff]   ;;  %v575_v3 = vld [vmem:[%s743_s1 + $0x28] sm:$0xff]  }
   0x2   :  { %510 = vmatprep.subr.bf16.mxu0 %v573_v0  ;;  %v576_v4 = vld [vmem:[%s743_s1 + $0x20] sm:$0xff]   ;;  %v172_v7 = vld [vmem:[%s745_s2 + $0x10] sm:$0xff]  ;;  %v171_v9 = vld [vmem:[%s745_s2 + $0x8] sm:$0xff] }
   0x3   :  { %511 = vmatpush3.bf16.msra.mxu0 %v573_v0  ;;  %v35_v5 = vld [vmem:[%s744_s0] sm:$0xff]  ;;  %186 = vperm.xlu1 %572, %v172_v7   ;;  %v173_v10 = vld [vmem:[%s745_s2 + $0x18] sm:$0xff]  ;;  %v582_v12 = vld [vmem:[%s746_s3 + $0x30] sm:$0xff]  }
   0x4   :  { %512 = vmatprep.subr.bf16.mxu0 %v574_v2  ;;  %v170_v6 = vld [vmem:[%s745_s2] sm:$0xff]  ;;  %v36_v8 = vunpack.c.l.s8.bf16 %v35_v5  ;;  %v581_v11 = vld [vmem:[%s746_s3 + $0x38] sm:$0xff]   ;;  %v583_v14 = vld [vmem:[%s746_s3 + $0x28] sm:$0xff]   ;;  %v37_v20 = vunpack.c.h.s8.bf16 %v35_v5 }
   0x5   :  { %176 = vperm.xlu0 %571, %v170_v6   ;;  %v577_v13 = vld [vmem:[%s743_s1 + $0x18] sm:$0xff]   ;;  %530 = vmatprep.subr.bf16.mxu1 %v581_v11  ;;  %v578_v15 = vld [vmem:[%s743_s1 + $0x10] sm:$0xff]   ;;  %v584_v16 = vld [vmem:[%s746_s3 + $0x20] sm:$0xff]  }
   0x6   :  { %526 = vmatprep.mubr.bf16.mxu0 %v36_v8  ;;  %531 = vmatpush3.bf16.msra.mxu1 %v581_v11  ;;  %v579_v17 = vld [vmem:[%s743_s1 + $0x8] sm:$0xff]   ;;  %v585_v18 = vld [vmem:[%s746_s3 + $0x18] sm:$0xff]   ;;  %v580_v19 = vld [vmem:[%s743_s1] sm:$0xff]  }
   0x7   :  { %513 = vmatpush3.bf16.msra.mxu0 %v574_v2  ;;  %191 = vperm.xlu1 %572, %v173_v10   ;;  %v586_v21 = vld [vmem:[%s746_s3 + $0x10] sm:$0xff]   ;;  %v587_v22 = vld [vmem:[%s746_s3 + $0x8] sm:$0xff]   ;;  %v588_v23 = vld [vmem:[%s746_s3] sm:$0xff]  }
   0x8   :  { %514 = vmatprep.subr.bf16.mxu0 %v575_v3  ;;  %532 = vmatprep.subr.bf16.mxu1 %v582_v12  ;;  %v589_v24 = vld [vmem:[%s747_s5 + $0x38] sm:$0xff]   ;;  %v590_v25 = vld [vmem:[%s747_s5 + $0x30] sm:$0xff]   ;;  %v591_v26 = vld [vmem:[%s747_s5 + $0x28] sm:$0xff]  }
   0x9   :  { %181 = vperm.xlu0 %571, %v171_v9   ;;  %v592_v27 = vld [vmem:[%s747_s5 + $0x20] sm:$0xff]   ;;  %v593_v28 = vld [vmem:[%s747_s5 + $0x18] sm:$0xff]   ;;  %v594_v43 = vld [vmem:[%s747_s5 + $0x10] sm:$0xff]  }
   0xa   :  { %533 = vmatpush3.bf16.msra.mxu1 %v582_v12  ;;  %v595_v44 = vld [vmem:[%s747_s5 + $0x8] sm:$0xff]   ;;  %v596_v45 = vld [vmem:[%s747_s5] sm:$0xff]  }
   0xb   :  { %515 = vmatpush3.bf16.msra.mxu0 %v575_v3  ;;  %534 = vmatprep.subr.bf16.mxu1 %v583_v14  ;;  %v462_v48 = vld [vmem:[%s748_s4] ss:$0 sm:$0xff] }
   0xc   :  { %516 = vmatprep.subr.bf16.mxu0 %v576_v4  ;;  %v471_v61 = vld [vmem:[%s749_s6] ss:$0 sm:$0xff] }
   0xe   :  { %535 = vmatpush3.bf16.msra.mxu1 %v583_v14 }
   0xf   :  { %517 = vmatpush3.bf16.msra.mxu0 %v576_v4  ;;  %536 = vmatprep.subr.bf16.mxu1 %v584_v16 }
  0x10   :  { %518 = vmatprep.subr.bf16.mxu0 %v577_v13 }
  0x12   :  { %537 = vmatpush3.bf16.msra.mxu1 %v584_v16 }
  0x13   :  { %519 = vmatpush3.bf16.msra.mxu0 %v577_v13  ;;  %538 = vmatprep.subr.bf16.mxu1 %v585_v18 }
  0x14   :  { %520 = vmatprep.subr.bf16.mxu0 %v578_v15 }
  0x16   :  { %539 = vmatpush3.bf16.msra.mxu1 %v585_v18 }
  0x17   :  { %521 = vmatpush3.bf16.msra.mxu0 %v578_v15  ;;  %540 = vmatprep.subr.bf16.mxu1 %v586_v21 }
  0x18   :  { %522 = vmatprep.subr.bf16.mxu0 %v579_v17 }
  0x1a   :  { %541 = vmatpush3.bf16.msra.mxu1 %v586_v21 }
  0x1b   :  { %523 = vmatpush3.bf16.msra.mxu0 %v579_v17  ;;  %542 = vmatprep.subr.bf16.mxu1 %v587_v22 }
  0x1c   :  { %524 = vmatprep.subr.bf16.mxu0 %v580_v19 }
  0x1e   :  { %543 = vmatpush3.bf16.msra.mxu1 %v587_v22 }
  0x1f   :  { %525 = vmatpush3.bf16.msra.mxu0 %v580_v19  ;;  %544 = vmatprep.subr.bf16.mxu1 %v588_v23 }
  0x20   :  { %550 = vmatprep.subr.bf16.mxu0 %v589_v24 }
  0x22   :  { %527 = vmatmul.mubr.bf16.vlgmr.msra.gmra.mxu0 %v37_v20  ;;  %545 = vmatpush3.bf16.msra.mxu1 %v588_v23 }
  0x23   :  { %551 = vmatpush3.bf16.msra.mxu0 %v589_v24 }
  0x24   :  { %552 = vmatprep.subr.bf16.mxu0 %v590_v25 }
  0x27   :  { %553 = vmatpush3.bf16.msra.mxu0 %v590_v25 }
  0x28   :  { %554 = vmatprep.subr.bf16.mxu0 %v591_v26 }
  0x2b   :  { %555 = vmatpush3.bf16.msra.mxu0 %v591_v26 }
  0x2c   :  { %556 = vmatprep.subr.bf16.mxu0 %v592_v27 }
  0x2f   :  { %557 = vmatpush3.bf16.msra.mxu0 %v592_v27 }
  0x30   :  { %558 = vmatprep.subr.bf16.mxu0 %v593_v28 }
  0x33   :  { %559 = vmatpush3.bf16.msra.mxu0 %v593_v28 }
  0x34   :  { %560 = vmatprep.subr.bf16.mxu0 %v594_v43 }
  0x37   :  { %561 = vmatpush3.bf16.msra.mxu0 %v594_v43 }
  0x38   :  { %562 = vmatprep.subr.bf16.mxu0 %v595_v44 }
  0x3b   :  { %563 = vmatpush3.bf16.msra.mxu0 %v595_v44 }
  0x3c   :  { %564 = vmatprep.subr.bf16.mxu0 %v596_v45 }
  0x3f   :  { %565 = vmatpush3.bf16.msra.mxu0 %v596_v45 }
  0x7e   :  { %v187_v29 = vpop.permute.xlu1 %186 }
  0x80   :  { %v177_v30 = vpop.permute.xlu0 %176 }
  0x82   :  { %v192_v33 = vpop.permute.xlu1 %191 }
  0x84   :  { %v182_v35 = vpop.permute.xlu0 %181 }
  0xe2   :  { %v528_v31 = vpop.f32.mrf.mxu0 }
  0xe3   :  { %v196_v40 = vmul.f32 %v528_v31, %v187_v29 }
  0xe4   :  { %v140_v32 = vpop.f32.mrf.mxu0 }
  0xe5   :  { %v194_v38 = vmul.f32 %v177_v30, %v140_v32 }
  0xe6   :  { %v529_v34 = vpop.f32.mrf.mxu0 }
  0xe7   :  { %v197_v36 = vmul.f32 %v529_v34, %v192_v33 }
  0xe8   :  { %v143_v37 = vpop.f32.mrf.mxu0 }
  0xe9   :  { %v195_v39 = vmul.f32 %v182_v35, %v143_v37  ;;  %v199_v42 = vpack.c.bf16 %v197_v36, %v196_v40 }
  0xeb   :  { %v198_v41 = vpack.c.bf16 %v195_v39, %v194_v38 }
  0xed   :  { %546 = vmatprep.mubr.bf16.mxu1 %v198_v41 }
  0xee   :  { %547 = vmatmul.mubr.bf16.vlgmr.msra.gmra.mxu1 %v199_v42 }
 0x1ae   :  { %v548_v46 = vpop.f32.mrf.mxu1 }
 0x1af   :  { %v314_v52 = vadd.f32 %v548_v46, %v462_v48 }
 0x1b0   :  { %v305_v47 = vpop.f32.mrf.mxu1 }
 0x1b1   :  { %v306_v50 = vadd.f32 %v462_v48, %v305_v47  ;;  %v322_v58 = vmax.f32 %v314_v52, 0.0 }
 0x1b2   :  { %v549_v49 = vpop.f32.mrf.mxu1 }
 0x1b3   :  { %v317_v51 = vadd.f32 %v549_v49, %v462_v48  ;;  %v320_v56 = vmax.f32 %v306_v50, 0.0 }
 0x1b4   :  { %v308_v53 = vpop.f32.mrf.mxu1 }
 0x1b5   :  { %v309_v54 = vadd.f32 %v462_v48, %v308_v53  ;;  %v323_v55 = vmax.f32 %v317_v51, 0.0 }
 0x1b7   :  { %v321_v57 = vmax.f32 %v309_v54, 0.0  ;;  %v325_v60 = vpack.c.bf16 %v323_v55, %v322_v58 }
 0x1b9   :  { %v324_v59 = vpack.c.bf16 %v321_v57, %v320_v56 }
 0x1bb   :  { %566 = vmatprep.mubr.bf16.mxu0 %v324_v59 }
 0x1bc   :  { %567 = vmatmul.mubr.bf16.vlgmr.msra.gmra.mxu0 %v325_v60 }
 0x27c   :  { %v568_v62 = vpop.f32.mrf.mxu0 }
 0x27d   :  { %v440_v63 = vadd.f32 %v568_v62, %v471_v61 }
 0x27e   :  { %v431_v0 = vpop.f32.mrf.mxu0 }
 0x27f   :  { %448 = vst [vmem:[%s750_s7 + $0x10] sm:$0xff] %v440_v63  ;;  %v432_v1 = vadd.f32 %v471_v61, %v431_v0 }
 0x280   :  { %v569_v2 = vpop.f32.mrf.mxu0 }
 0x281   :  { %446 = vst [vmem:[%s750_s7] sm:$0xff] %v432_v1  ;;  %v443_v3 = vadd.f32 %v569_v2, %v471_v61 }
 0x282   :  { %v434_v4 = vpop.f32.mrf.mxu0 }
 0x283   :  { %449 = vst [vmem:[%s750_s7 + $0x18] sm:$0xff] %v443_v3  ;;  %v435_v5 = vadd.f32 %v471_v61, %v434_v4 }
 0x285   :  { %447 = vst [vmem:[%s750_s7 + $0x8] sm:$0xff] %v435_v5 }

</bundles_post_ra>
